<compile_context>
chip_gen: v7x
topology: tpu7x:2x2x1
jax: 0.10.0
libtpu: 0.0.40
codegen_flags: <defaults>
</compile_context>

<pallas_src>
import functools
import math

import jax
import jax.numpy as jnp
from jax import lax
from jax.experimental import pallas as pl
from jax.experimental.pallas import tpu as pltpu


_LANE = 128  # lane width: keep the last dim 128 for dense, unmasked stores

# int32 hash / stream constants (all valid int32 literals)
_M1 = 0x7FEB352D            # lowbias32 multiplier 1
_M2 = -2073254261           # 0x846CA68B re-interpreted as int32
_TAG_U1 = 0x1B873593        # stream tag for the first uniform draw
_TAG_U2 = 0x5BD1E995        # stream tag for the second uniform draw


def _srl(x, k):
    """Logical right shift for int32 (arithmetic shift + mask), portable."""
    return (x >> k) & jnp.int32((1 << (32 - k)) - 1)


def _hash32(x):
    """lowbias32-style avalanche hash on int32 (wrapping arithmetic)."""
    x = x ^ _srl(x, 16)
    x = x * jnp.int32(_M1)
    x = x ^ _srl(x, 15)
    x = x * jnp.int32(_M2)
    x = x ^ _srl(x, 16)
    return x


def _uniform_open01(cnt, key, tag):
    """Counter-based uniform in (0, 1] with 24-bit resolution (log is finite)."""
    t = jnp.int32(tag)
    h = _hash32(cnt ^ (key + t))
    h = _hash32(h + t)
    m = h & jnp.int32(0x00FFFFFF)                     # 24 low bits, >= 0
    return (m.astype(jnp.float32) + 1.0) * jnp.float32(1.0 / (1 << 24))


# ----------------------------------------------------------------------------
# Pallas kernel: one [block_rows, 128] tile of  y = x * (1 + sigma * N(0,1))
# ----------------------------------------------------------------------------
def _gaussian_noise_kernel(seed_ref, x_ref, o_ref, *, sigma):
    key = seed_ref[0]
    i = pl.program_id(0)

    block_rows = x_ref.shape[0]
    x = x_ref[...].astype(jnp.float32)

    sigma_f = jnp.float32(sigma)
    two_pi = jnp.float32(2.0 * math.pi)

    # When the block has an even (16-aligned) row count, draw uniforms for only
    # half the rows and use BOTH Box-Muller outputs (cos -> top half,
    # sin -> bottom half): halves PRNG / log / sqrt work per element.
    use_pair = (block_rows % 16 == 0)
    half = block_rows // 2 if use_pair else block_rows
    shape = (half, _LANE)

    row = lax.broadcasted_iota(jnp.int32, shape, 0)
    col = lax.broadcasted_iota(jnp.int32, shape, 1)
    cnt = (i * half + row) * jnp.int32(_LANE) + col   # unique per element/pair

    u1 = _uniform_open01(cnt, key, _TAG_U1)           # (0, 1]
    u2 = _uniform_open01(cnt, key, _TAG_U2)

    r = jnp.sqrt(jnp.float32(-2.0) * jnp.log(u1))
    theta = two_pi * u2

    if use_pair:
        z = jnp.concatenate([r * jnp.cos(theta), r * jnp.sin(theta)], axis=0)
    else:
        z = r * jnp.cos(theta)

    o_ref[...] = (x * (jnp.float32(1.0) + sigma_f * z)).astype(o_ref.dtype)


# ----------------------------------------------------------------------------
# Wrapper: lane-dense [rows, 128] view, 1-D grid over row blocks.
# ----------------------------------------------------------------------------
def _choose_block_rows(rows, requested):
    if rows <= 16:
        return rows                                   # single full-extent block
    br = max(16, (min(int(requested), rows) // 16) * 16)
    # For large tensors keep >= 8 grid steps (v7x: 2 TensorCores) as long as
    # blocks stay >= 2048 rows (~1-2 MiB) so per-step overhead stays amortized.
    eighth = ((rows // 8) // 16) * 16
    if eighth >= 2048:
        br = min(br, eighth)
    return br


def gaussian_noise(x, seed, *, sigma=0.1, training=True, block_rows=4096):
    """Forward pass of GaussianNoise: y = x * (1 + sigma * N(0,1))."""
    if (not training) or sigma == 0.0:
        return x                                      # identity, no kernel
    total = x.size
    if total == 0:
        return x

    orig_shape = x.shape
    orig_dtype = x.dtype

    # Native-dtype I/O for f32/bf16 (halves DMA traffic for bf16); anything
    # else is streamed through the kernel as f32.
    if x.dtype in (jnp.dtype(jnp.float32), jnp.dtype(jnp.bfloat16)):
        io_dtype = x.dtype
    else:
        io_dtype = jnp.dtype(jnp.float32)
    x_io = x if x.dtype == io_dtype else x.astype(io_dtype)

    # Lane-dense [rows, 128] view; pad only in the rare total % 128 != 0 case.
    if total % _LANE == 0:
        rows = total // _LANE
        x2d = x_io.reshape(rows, _LANE)
        padded = False
    else:
        rows = -(-total // _LANE)
        x2d = jnp.pad(x_io.reshape(-1), (0, rows * _LANE - total)).reshape(rows, _LANE)
        padded = True

    br = _choose_block_rows(rows, block_rows)
    grid = (pl.cdiv(rows, br),)

    cost = pl.CostEstimate(
        flops=40 * rows * _LANE,
        transcendentals=2 * rows * _LANE,
        bytes_accessed=2 * rows * _LANE * x2d.dtype.itemsize,
    )

    out2d = pl.pallas_call(
        functools.partial(_gaussian_noise_kernel, sigma=float(sigma)),
        out_shape=jax.ShapeDtypeStruct((rows, _LANE), io_dtype),
        grid_spec=pltpu.PrefetchScalarGridSpec(
            num_scalar_prefetch=1,                    # seed lands in SMEM
            grid=grid,
            in_specs=[pl.BlockSpec((br, _LANE), lambda i, seed_ref: (i, 0))],
            out_specs=pl.BlockSpec((br, _LANE), lambda i, seed_ref: (i, 0)),
        ),
        compiler_params=pltpu.CompilerParams(
            dimension_semantics=("parallel",),        # blocks are independent
            vmem_limit_bytes=32 * 1024 * 1024,
        ),
        cost_estimate=cost,
    )(jnp.asarray([seed], dtype=jnp.int32), x2d)

    out = out2d.reshape(-1)[:total].reshape(orig_shape) if padded else out2d.reshape(orig_shape)
    return out if out.dtype == orig_dtype else out.astype(orig_dtype)


# ----------------------------------------------------------------------------
# Self-test
# ----------------------------------------------------------------------------
if __name__ == "__main__":
    SIGMA = 0.1
    key = jax.random.PRNGKey(0)
    x = jax.random.normal(key, (2, 4, 16, 16), jnp.float32)

    # Training mode: noise applied.
    y = jax.block_until_ready(gaussian_noise(x, seed=42, sigma=SIGMA, training=True))
    assert y.shape == x.shape and y.dtype == x.dtype
    assert bool(jnp.all(jnp.isfinite(y)))
    assert not jnp.array_equal(y, x)

    # Determinism: same seed -> identical noise; different seed -> different.
    y_same = jax.block_until_ready(gaussian_noise(x, seed=42, sigma=SIGMA, training=True))
    assert jnp.array_equal(y, y_same)
    y_other = jax.block_until_ready(gaussian_noise(x, seed=7, sigma=SIGMA, training=True))
    assert not jnp.array_equal(y, y_other)

    # Eval mode (and sigma == 0): exact identity, no kernel launch.
    assert jnp.array_equal(gaussian_noise(x, seed=42, sigma=SIGMA, training=False), x)
    assert jnp.array_equal(gaussian_noise(x, seed=42, sigma=0.0, training=True), x)

    # bf16 path keeps native dtype I/O.
    y_bf = jax.block_until_ready(
        gaussian_noise(x.astype(jnp.bfloat16), seed=42, sigma=SIGMA, training=True))
    assert y_bf.dtype == jnp.bfloat16 and y_bf.shape == x.shape

    # Statistical check on x == 1:  y = 1 + sigma * z  =>  z ~ N(0, 1).
    ones = jnp.ones((256, 128), jnp.float32)
    y1 = jax.block_until_ready(gaussian_noise(ones, seed=123, sigma=SIGMA, training=True))
    z = ((y1 - 1.0) / SIGMA).reshape(-1)
    z_mean = float(jnp.mean(z))
    z_std = float(jnp.std(z))
    assert abs(z_mean) < 0.05, f"noise mean off: {z_mean}"
    assert 0.9 < z_std < 1.1, f"noise std off: {z_std}"

    print("KERNEL_OK")
</pallas_src>

<mosaic_0001>
module attributes {stable_mosaic.version = 11 : i64} {
  func.func @_gaussian_noise_kernel(%arg0: i32, %arg1: memref<1xi32, #tpu.memory_space<smem>>, %arg2: memref<16x128xf32, #tpu.memory_space<vmem>>, %arg3: memref<16x128xf32, #tpu.memory_space<vmem>>) attributes {dimension_semantics = [#tpu.dimension_semantics<parallel>], iteration_bounds = array<i64: 1>, scalar_prefetch = 1 : i64, scratch_operands = 0 : i64, tpu.core_type = #tpu.core_type<tc>, window_params = [{transform_indices = @transform_0, window_bounds = array<i64: 16, 128>}, {transform_indices = @transform_1, window_bounds = array<i64: 16, 128>}]} {
    %c0 = arith.constant 0 : index
    %0 = memref.load %arg1[%c0] : memref<1xi32, #tpu.memory_space<smem>>
    %c0_0 = arith.constant 0 : index
    %c0_1 = arith.constant 0 : index
    %1 = vector.load %arg2[%c0_0, %c0_1] : memref<16x128xf32, #tpu.memory_space<vmem>>, vector<16x128xf32>
    %2 = tpu.iota {dimensions = array<i32: 0>} : vector<8x128xi32>
    %3 = tpu.iota {dimensions = array<i32: 1>} : vector<8x128xi32>
    %c8_i32 = arith.constant 8 : i32
    %4 = arith.muli %arg0, %c8_i32 : i32
    %5 = vector.broadcast %4 : i32 to vector<8x128xi32>
    %6 = arith.addi %5, %2 : vector<8x128xi32>
    %c128_i32 = arith.constant 128 : i32
    %7 = vector.broadcast %c128_i32 : i32 to vector<8x128xi32>
    %8 = arith.muli %6, %7 : vector<8x128xi32>
    %9 = arith.addi %8, %3 : vector<8x128xi32>
    %c461845907_i32 = arith.constant 461845907 : i32
    %10 = arith.addi %0, %c461845907_i32 : i32
    %11 = vector.broadcast %10 : i32 to vector<8x128xi32>
    %12 = arith.xori %9, %11 : vector<8x128xi32>
    %c16_i32 = arith.constant 16 : i32
    %13 = vector.broadcast %c16_i32 : i32 to vector<8x128xi32>
    %14 = arith.shrsi %12, %13 : vector<8x128xi32>
    %c65535_i32 = arith.constant 65535 : i32
    %15 = vector.broadcast %c65535_i32 : i32 to vector<8x128xi32>
    %16 = arith.andi %14, %15 : vector<8x128xi32>
    %17 = arith.xori %12, %16 : vector<8x128xi32>
    %c2146121005_i32 = arith.constant 2146121005 : i32
    %18 = vector.broadcast %c2146121005_i32 : i32 to vector<8x128xi32>
    %19 = arith.muli %17, %18 : vector<8x128xi32>
    %c15_i32 = arith.constant 15 : i32
    %20 = vector.broadcast %c15_i32 : i32 to vector<8x128xi32>
    %21 = arith.shrsi %19, %20 : vector<8x128xi32>
    %c131071_i32 = arith.constant 131071 : i32
    %22 = vector.broadcast %c131071_i32 : i32 to vector<8x128xi32>
    %23 = arith.andi %21, %22 : vector<8x128xi32>
    %24 = arith.xori %19, %23 : vector<8x128xi32>
    %c-2073254261_i32 = arith.constant -2073254261 : i32
    %25 = vector.broadcast %c-2073254261_i32 : i32 to vector<8x128xi32>
    %26 = arith.muli %24, %25 : vector<8x128xi32>
    %c16_i32_2 = arith.constant 16 : i32
    %27 = vector.broadcast %c16_i32_2 : i32 to vector<8x128xi32>
    %28 = arith.shrsi %26, %27 : vector<8x128xi32>
    %c65535_i32_3 = arith.constant 65535 : i32
    %29 = vector.broadcast %c65535_i32_3 : i32 to vector<8x128xi32>
    %30 = arith.andi %28, %29 : vector<8x128xi32>
    %31 = arith.xori %26, %30 : vector<8x128xi32>
    %c461845907_i32_4 = arith.constant 461845907 : i32
    %32 = vector.broadcast %c461845907_i32_4 : i32 to vector<8x128xi32>
    %33 = arith.addi %31, %32 : vector<8x128xi32>
    %c16_i32_5 = arith.constant 16 : i32
    %34 = vector.broadcast %c16_i32_5 : i32 to vector<8x128xi32>
    %35 = arith.shrsi %33, %34 : vector<8x128xi32>
    %c65535_i32_6 = arith.constant 65535 : i32
    %36 = vector.broadcast %c65535_i32_6 : i32 to vector<8x128xi32>
    %37 = arith.andi %35, %36 : vector<8x128xi32>
    %38 = arith.xori %33, %37 : vector<8x128xi32>
    %c2146121005_i32_7 = arith.constant 2146121005 : i32
    %39 = vector.broadcast %c2146121005_i32_7 : i32 to vector<8x128xi32>
    %40 = arith.muli %38, %39 : vector<8x128xi32>
    %c15_i32_8 = arith.constant 15 : i32
    %41 = vector.broadcast %c15_i32_8 : i32 to vector<8x128xi32>
    %42 = arith.shrsi %40, %41 : vector<8x128xi32>
    %c131071_i32_9 = arith.constant 131071 : i32
    %43 = vector.broadcast %c131071_i32_9 : i32 to vector<8x128xi32>
    %44 = arith.andi %42, %43 : vector<8x128xi32>
    %45 = arith.xori %40, %44 : vector<8x128xi32>
    %c-2073254261_i32_10 = arith.constant -2073254261 : i32
    %46 = vector.broadcast %c-2073254261_i32_10 : i32 to vector<8x128xi32>
    %47 = arith.muli %45, %46 : vector<8x128xi32>
    %c16_i32_11 = arith.constant 16 : i32
    %48 = vector.broadcast %c16_i32_11 : i32 to vector<8x128xi32>
    %49 = arith.shrsi %47, %48 : vector<8x128xi32>
    %c65535_i32_12 = arith.constant 65535 : i32
    %50 = vector.broadcast %c65535_i32_12 : i32 to vector<8x128xi32>
    %51 = arith.andi %49, %50 : vector<8x128xi32>
    %52 = arith.xori %47, %51 : vector<8x128xi32>
    %c16777215_i32 = arith.constant 16777215 : i32
    %53 = vector.broadcast %c16777215_i32 : i32 to vector<8x128xi32>
    %54 = arith.andi %52, %53 : vector<8x128xi32>
    %55 = arith.sitofp %54 : vector<8x128xi32> to vector<8x128xf32>
    %cst = arith.constant 1.000000e+00 : f32
    %56 = vector.broadcast %cst : f32 to vector<8x128xf32>
    %57 = arith.addf %55, %56 : vector<8x128xf32>
    %cst_13 = arith.constant 5.96046448E-8 : f32
    %58 = vector.broadcast %cst_13 : f32 to vector<8x128xf32>
    %59 = arith.mulf %57, %58 : vector<8x128xf32>
    %c1540483477_i32 = arith.constant 1540483477 : i32
    %60 = arith.addi %0, %c1540483477_i32 : i32
    %61 = vector.broadcast %60 : i32 to vector<8x128xi32>
    %62 = arith.xori %9, %61 : vector<8x128xi32>
    %c16_i32_14 = arith.constant 16 : i32
    %63 = vector.broadcast %c16_i32_14 : i32 to vector<8x128xi32>
    %64 = arith.shrsi %62, %63 : vector<8x128xi32>
    %c65535_i32_15 = arith.constant 65535 : i32
    %65 = vector.broadcast %c65535_i32_15 : i32 to vector<8x128xi32>
    %66 = arith.andi %64, %65 : vector<8x128xi32>
    %67 = arith.xori %62, %66 : vector<8x128xi32>
    %c2146121005_i32_16 = arith.constant 2146121005 : i32
    %68 = vector.broadcast %c2146121005_i32_16 : i32 to vector<8x128xi32>
    %69 = arith.muli %67, %68 : vector<8x128xi32>
    %c15_i32_17 = arith.constant 15 : i32
    %70 = vector.broadcast %c15_i32_17 : i32 to vector<8x128xi32>
    %71 = arith.shrsi %69, %70 : vector<8x128xi32>
    %c131071_i32_18 = arith.constant 131071 : i32
    %72 = vector.broadcast %c131071_i32_18 : i32 to vector<8x128xi32>
    %73 = arith.andi %71, %72 : vector<8x128xi32>
    %74 = arith.xori %69, %73 : vector<8x128xi32>
    %c-2073254261_i32_19 = arith.constant -2073254261 : i32
    %75 = vector.broadcast %c-2073254261_i32_19 : i32 to vector<8x128xi32>
    %76 = arith.muli %74, %75 : vector<8x128xi32>
    %c16_i32_20 = arith.constant 16 : i32
    %77 = vector.broadcast %c16_i32_20 : i32 to vector<8x128xi32>
    %78 = arith.shrsi %76, %77 : vector<8x128xi32>
    %c65535_i32_21 = arith.constant 65535 : i32
    %79 = vector.broadcast %c65535_i32_21 : i32 to vector<8x128xi32>
    %80 = arith.andi %78, %79 : vector<8x128xi32>
    %81 = arith.xori %76, %80 : vector<8x128xi32>
    %c1540483477_i32_22 = arith.constant 1540483477 : i32
    %82 = vector.broadcast %c1540483477_i32_22 : i32 to vector<8x128xi32>
    %83 = arith.addi %81, %82 : vector<8x128xi32>
    %c16_i32_23 = arith.constant 16 : i32
    %84 = vector.broadcast %c16_i32_23 : i32 to vector<8x128xi32>
    %85 = arith.shrsi %83, %84 : vector<8x128xi32>
    %c65535_i32_24 = arith.constant 65535 : i32
    %86 = vector.broadcast %c65535_i32_24 : i32 to vector<8x128xi32>
    %87 = arith.andi %85, %86 : vector<8x128xi32>
    %88 = arith.xori %83, %87 : vector<8x128xi32>
    %c2146121005_i32_25 = arith.constant 2146121005 : i32
    %89 = vector.broadcast %c2146121005_i32_25 : i32 to vector<8x128xi32>
    %90 = arith.muli %88, %89 : vector<8x128xi32>
    %c15_i32_26 = arith.constant 15 : i32
    %91 = vector.broadcast %c15_i32_26 : i32 to vector<8x128xi32>
    %92 = arith.shrsi %90, %91 : vector<8x128xi32>
    %c131071_i32_27 = arith.constant 131071 : i32
    %93 = vector.broadcast %c131071_i32_27 : i32 to vector<8x128xi32>
    %94 = arith.andi %92, %93 : vector<8x128xi32>
    %95 = arith.xori %90, %94 : vector<8x128xi32>
    %c-2073254261_i32_28 = arith.constant -2073254261 : i32
    %96 = vector.broadcast %c-2073254261_i32_28 : i32 to vector<8x128xi32>
    %97 = arith.muli %95, %96 : vector<8x128xi32>
    %c16_i32_29 = arith.constant 16 : i32
    %98 = vector.broadcast %c16_i32_29 : i32 to vector<8x128xi32>
    %99 = arith.shrsi %97, %98 : vector<8x128xi32>
    %c65535_i32_30 = arith.constant 65535 : i32
    %100 = vector.broadcast %c65535_i32_30 : i32 to vector<8x128xi32>
    %101 = arith.andi %99, %100 : vector<8x128xi32>
    %102 = arith.xori %97, %101 : vector<8x128xi32>
    %c16777215_i32_31 = arith.constant 16777215 : i32
    %103 = vector.broadcast %c16777215_i32_31 : i32 to vector<8x128xi32>
    %104 = arith.andi %102, %103 : vector<8x128xi32>
    %105 = arith.sitofp %104 : vector<8x128xi32> to vector<8x128xf32>
    %cst_32 = arith.constant 1.000000e+00 : f32
    %106 = vector.broadcast %cst_32 : f32 to vector<8x128xf32>
    %107 = arith.addf %105, %106 : vector<8x128xf32>
    %cst_33 = arith.constant 5.96046448E-8 : f32
    %108 = vector.broadcast %cst_33 : f32 to vector<8x128xf32>
    %109 = arith.mulf %107, %108 : vector<8x128xf32>
    %110 = math.log %59 : vector<8x128xf32>
    %cst_34 = arith.constant -2.000000e+00 : f32
    %111 = vector.broadcast %cst_34 : f32 to vector<8x128xf32>
    %112 = arith.mulf %111, %110 : vector<8x128xf32>
    %113 = math.sqrt %112 : vector<8x128xf32>
    %cst_35 = arith.constant 6.28318548 : f32
    %114 = vector.broadcast %cst_35 : f32 to vector<8x128xf32>
    %115 = arith.mulf %114, %109 : vector<8x128xf32>
    %116 = math.cos %115 : vector<8x128xf32>
    %117 = arith.mulf %113, %116 : vector<8x128xf32>
    %118 = math.sin %115 : vector<8x128xf32>
    %119 = arith.mulf %113, %118 : vector<8x128xf32>
    %120 = tpu.concatenate %117, %119 in 0 : vector<8x128xf32>, vector<8x128xf32> -> vector<16x128xf32>
    %cst_36 = arith.constant 1.000000e-01 : f32
    %121 = vector.broadcast %cst_36 : f32 to vector<16x128xf32>
    %122 = arith.mulf %121, %120 : vector<16x128xf32>
    %cst_37 = arith.constant 1.000000e+00 : f32
    %123 = vector.broadcast %cst_37 : f32 to vector<16x128xf32>
    %124 = arith.addf %123, %122 : vector<16x128xf32>
    %125 = arith.mulf %1, %124 : vector<16x128xf32>
    %c0_38 = arith.constant 0 : index
    %c0_39 = arith.constant 0 : index
    %126 = vector.load %arg3[%c0_38, %c0_39] : memref<16x128xf32, #tpu.memory_space<vmem>>, vector<16x128xf32>
    tpu.vector_store %arg3[%c0_38, %c0_39], %125 {strides = array<i32>} : memref<16x128xf32, #tpu.memory_space<vmem>>, vector<16x128xf32>,
    return
  }
  func.func @transform_0(%arg0: i32, %arg1: memref<1xi32, #tpu.memory_space<smem>>) -> (i32, i32) {
    %c0_i32 = arith.constant 0 : i32
    %c0_i32_0 = arith.constant 0 : i32
    return %arg0, %c0_i32 : i32, i32
  }
  func.func @transform_1(%arg0: i32, %arg1: memref<1xi32, #tpu.memory_space<smem>>) -> (i32, i32) {
    %c0_i32 = arith.constant 0 : i32
    %c0_i32_0 = arith.constant 0 : i32
    return %arg0, %c0_i32 : i32, i32
  }
}

</mosaic_0001>

<bundles_post_ra>
// kernel: tpu_custom_call.1
= control target key start
LH: loop header
LB: loop body
LE: loop exit
PB: predicated region body
PF: predicated region fallthrough
CT: control target
= control target key end

     0   :  { %8 = vsyncpa [#allocation5], 0  ;;  %s514_s0 = inlined_call_operand.<no memory space> [shape: s32[1], index: 0, kind: input, shape index: {}]   ;;  %s515_s1 = inlined_call_operand.hbm [shape: f32[16,128], index: 1, kind: input, shape index: {}]   ;;  %s516_s2 = inlined_call_operand.hbm [shape: f32[16,128], index: 2, kind: output, shape index: {}]  }
   0x1   :  { %9 = vsyncpa [#allocation6], 0  ;;  %s432_s9 = smov [#allocation4]   ;;  %s384_s13 = scalar_lea.hbm %s515_s1, 256 }
   0x2   :  { %s15_s10 = sshll.u32 %s432_s9, 4  ;;  %p385_p0 = scmp.ne.s32.totalorder %s515_s1, %s384_s13  ;;  %s16_s10 = int_to_ptr.vmem [resolvable:$true] %s15_s10 }
   0x3   :  { %p388_p1 = scmp.lt.u32.totalorder %s384_s13, %s515_s1 }
   0x5   :  { %p390_p2 = pnand %p388_p1, %p385_p0 }
   0x7   :  { %393 = shalt.err (!%p390_p2)
}
   0x8   :  { %s394_s18 = scalar_lea.vmem %s16_s10, 256  ;;  %p399_p4 = scmp.lt.s32.totalorder %s16_s10, %s16_s10 }
   0x9   :  { %p395_p3 = scmp.ne.s32.totalorder %s16_s10, %s394_s18  ;;  %p400_p5 = scmp.lt.s32.totalorder %s394_s18, %s394_s18 }
   0xb   :  { %p401_p6 = por %p400_p5, %p399_p4 }
   0xd   :  { %p402_p7 = pnand %p401_p6, %p395_p3 }
   0xf   :  { %405 = shalt.err (!%p402_p7)
}
  0x10   :  { %s433_s19 = smov 128   ;;  %s434_s20 = smov 8  }
  0x11   :  { %21 = dma.hbm_to_vmem [thread:$0]  %s515_s1, 256, %s16_s10, [#allocation5], %s433_s19, %s433_s19, %s434_s20  }
  0x12   :  { %428 = dma.done.wait [#allocation5], 256  }
  0x13   :  { %429 = vsyncadd [#allocation5], 4294967040  ;;  %v28_v0 = vlaneseq  ;;  %s37_s25 = sadd.s32 461845907, %s514_s0  ;;  %s67_s28 = sadd.s32 1540483477, %s514_s0 }
  0x14   :  { %v38_v4 = vstv %s37_s25  ;;  %v68_v5 = vstv %s67_s28  ;;  %v435_v58 = vmov 683565275   ;;  %v436_v60 = vmov 2475754826   ;;  %s441_s0 = smov [#allocation7]  }
  0x15   :  { %v29_v1 = vshrl.u32 %v28_v0, 7  ;;  %v31_v2 = vand.u32 127, %v28_v0  ;;  %v437_v62 = vmov 2131351028   ;;  %s330_s1 = sshll.u32 %s441_s0, 4  ;;  %s331_s1 = int_to_ptr.vmem [resolvable:$true] %s330_s1 }
  0x16   :  { %s406_s29 = scalar_lea.vmem %s331_s1, 256  ;;  %p411_p9 = scmp.lt.s32.totalorder %s331_s1, %s331_s1 }
  0x17   :  { %v35_v3 = vmul.u32 128, %v29_v1  ;;  %p407_p8 = scmp.ne.s32.totalorder %s331_s1, %s406_s29  ;;  %p412_p10 = scmp.lt.s32.totalorder %s406_s29, %s406_s29 }
  0x19   :  { %v36_v6 = vadd.s32 %v35_v3, %v31_v2  ;;  %p413_p11 = por %p412_p10, %p411_p9 }
  0x1b   :  { %v39_v7 = vxor.u32 %v38_v4, %v36_v6  ;;  %v69_v8 = vxor.u32 %v68_v5, %v36_v6  ;;  %v438_v5 = vmov 2102212464   ;;  %p414_p12 = pnand %p413_p11, %p407_p8 }
  0x1d   :  { %v342_v9 = vshrl.u32 %v39_v7, 16  ;;  %v348_v10 = vshrl.u32 %v69_v8, 16 }
  0x1f   :  { %v42_v11 = vxor.u32 %v342_v9, %v39_v7  ;;  %v72_v12 = vxor.u32 %v348_v10, %v69_v8  ;;  %v439_v8 = vmov 920167782  }
  0x21   :  { %v43_v13 = vmul.u32 2146121005, %v42_v11  ;;  %v73_v14 = vmul.u32 2146121005, %v72_v12  ;;  %v440_v11 = vmov 1326507024  }
  0x23   :  { %v343_v15 = vshrl.u32 %v43_v13, 15  ;;  %v349_v16 = vshrl.u32 %v73_v14, 15 }
  0x25   :  { %v76_v17 = vxor.u32 %v349_v16, %v73_v14  ;;  %v46_v18 = vxor.u32 %v343_v15, %v43_v13 }
  0x27   :  { %v77_v19 = vmul.u32 2221713035, %v76_v17  ;;  %v47_v21 = vmul.u32 2221713035, %v46_v18 }
  0x29   :  { %v350_v20 = vshrl.u32 %v77_v19, 16  ;;  %v344_v24 = vshrl.u32 %v47_v21, 16 }
  0x2b   :  { %v80_v22 = vxor.u32 %v350_v20, %v77_v19  ;;  %v50_v27 = vxor.u32 %v344_v24, %v47_v21 }
  0x2d   :  { %v81_v23 = vadd.s32 1540483477, %v80_v22  ;;  %v51_v30 = vadd.s32 461845907, %v50_v27 }
  0x2f   :  { %v351_v25 = vshrl.u32 %v81_v23, 16  ;;  %v345_v33 = vshrl.u32 %v51_v30, 16 }
  0x31   :  { %v84_v26 = vxor.u32 %v351_v25, %v81_v23  ;;  %v54_v36 = vxor.u32 %v345_v33, %v51_v30 }
  0x33   :  { %v85_v28 = vmul.u32 2146121005, %v84_v26  ;;  %v55_v39 = vmul.u32 2146121005, %v54_v36 }
  0x35   :  { %v352_v29 = vshrl.u32 %v85_v28, 15  ;;  %v346_v42 = vshrl.u32 %v55_v39, 15 }
  0x37   :  { %v88_v31 = vxor.u32 %v352_v29, %v85_v28  ;;  %v58_v45 = vxor.u32 %v346_v42, %v55_v39 }
  0x39   :  { %v89_v32 = vmul.u32 2221713035, %v88_v31  ;;  %v59_v49 = vmul.u32 2221713035, %v58_v45 }
  0x3b   :  { %v353_v34 = vshrl.u32 %v89_v32, 16  ;;  %v347_v52 = vshrl.u32 %v59_v49, 16 }
  0x3d   :  { %v92_v35 = vxor.u32 %v353_v34, %v89_v32  ;;  %v62_v0 = vxor.u32 %v347_v52, %v59_v49 }
  0x3f   :  { %v93_v37 = vand.u32 16777215, %v92_v35  ;;  %v63_v27 = vand.u32 16777215, %v62_v0 }
  0x41   :  { %v94_v38 = vcvt.s32.f32 %v93_v37  ;;  %v64_v36 = vcvt.s32.f32 %v63_v27 }
  0x43   :  { %v95_v40 = vadd.f32 1.0, %v94_v38 }
  0x45   :  { %v96_v41 = vmul.f32 5.9604645e-08, %v95_v40  ;;  %v65_v40 = vadd.f32 1.0, %v64_v36 }
  0x47   :  { %v478_v43 = vmul.f32 6.2831855, %v96_v41 }
  0x49   :  { %v111_v44 = vand.u32 2139095040, %v478_v43  ;;  %v108_v46 = vand.u32 2147483647, %v478_v43  ;;  %vm110_vm7 = vcmp.lt.s32.totalorder %v478_v43, 0 }
  0x4b   :  { %v112_v47 = vshrl.u32 %v111_v44, 23  ;;  %v115_v50 = vand.u32 8388607, %v108_v46  ;;  %v66_v44 = vmul.f32 5.9604645e-08, %v65_v40  ;;  %vm109_vm8 = vcmp.le.f32.partialorder %v108_v46, 0.7853982 }
  0x4d   :  { %v354_v48 = vadd.s32 4294967169, %v112_v47  ;;  %v116_v53 = vor.u32 8388608, %v115_v50  ;;  %376 = vlog2.f32 %v66_v44 }
  0x4f   :  { %v118_v51 = vadd.s32 1, %v354_v48  ;;  %v156_v1 = vshll.u32 %v116_v53, 8 }
  0x51   :  { %vm119_vm0 = vcmp.gt.s32.totalorder %v118_v51, 0 }
  0x52   :  { %v120_v54 = vsel %vm119_vm0, %v118_v51, 0 }
  0x53   :  { %v122_v55 = vand.u32 31, %v120_v54  ;;  %v121_v56 = vshrl.u32 %v120_v54, 5 }
  0x55   :  { %v123_v57 = vsub.s32 32, %v122_v55  ;;  %v125_v59 = vshll.u32 %v435_v58, %v122_v55  ;;  %v128_v61 = vshll.u32 %v436_v60, %v122_v55  ;;  %v131_v63 = vshll.u32 %v437_v62, %v122_v55 }
  0x56   :  { %v134_v7 = vshll.u32 %v438_v5, %v122_v55  ;;  %v137_v10 = vshll.u32 %v439_v8, %v122_v55  ;;  %vm140_vm1 = vcmp.lt.s32.totalorder %v121_v56, 1  ;;  %vm141_vm2 = vcmp.lt.s32.totalorder %v121_v56, 2 }
  0x57   :  { %v124_v2 = vshrl.u32 %v435_v58, %v123_v57  ;;  %v126_v3 = vshrl.u32 %v436_v60, %v123_v57  ;;  %v129_v4 = vshrl.u32 %v437_v62, %v123_v57  ;;  %v132_v6 = vshrl.u32 %v438_v5, %v123_v57  ;;  %v377_v53 = vpop.eup %376 }
  0x58   :  { %v135_v9 = vshrl.u32 %v439_v8, %v123_v57  ;;  %v138_v12 = vshrl.u32 %v440_v11, %v123_v57  ;;  %vm142_vm3 = vcmp.lt.s32.totalorder %v121_v56, 3  ;;  %vm143_vm4 = vcmp.lt.s32.totalorder %v121_v56, 4 }
  0x59   :  { %v127_v13 = vor.u32 %v126_v3, %v125_v59  ;;  %v130_v14 = vor.u32 %v129_v4, %v128_v61  ;;  %v133_v15 = vor.u32 %v132_v6, %v131_v63  ;;  %v98_v58 = vmul.f32 0.6931472, %v377_v53 }
  0x5a   :  { %v136_v16 = vor.u32 %v135_v9, %v134_v7  ;;  %v139_v17 = vor.u32 %v138_v12, %v137_v10 }
  0x5b   :  { %v144_v18 = vsel %vm140_vm1, %v124_v2, %v127_v13  ;;  %v148_v19 = vsel %vm140_vm1, %v127_v13, %v130_v14  ;;  %v152_v20 = vsel %vm140_vm1, %v130_v14, %v133_v15  ;;  %v145_v21 = vsel %vm143_vm4, %v133_v15, 2102212464 }
  0x5c   :  { %v149_v22 = vsel %vm143_vm4, %v136_v16, 920167782  ;;  %v153_v23 = vsel %vm143_vm4, %v139_v17, 1326507024  ;;  %v146_v24 = vsel %vm142_vm3, %v130_v14, %v145_v21  ;;  %v99_v63 = vmul.f32 -2.0, %v98_v58 }
  0x5d   :  { %v150_v25 = vsel %vm142_vm3, %v133_v15, %v149_v22  ;;  %v154_v26 = vsel %vm142_vm3, %v136_v16, %v153_v23  ;;  %v147_v28 = vsel %vm141_vm2, %v144_v18, %v146_v24  ;;  %vm200_vm1 = vweird.f32 %v478_v43 }
  0x5e   :  { %v151_v29 = vsel %vm141_vm2, %v148_v19, %v150_v25  ;;  %v155_v30 = vsel %vm141_vm2, %v152_v20, %v154_v26  ;;  %v163_v35 = vmul.u32 %v156_v1, %v147_v28  ;;  %378 = vrsqrt.f32 %v99_v63 }
  0x5f   :  { %v484_v31 = vmul.u32.u64.low %v156_v1, %v155_v30  ;;  %v485_v32 = vmul.u32.u64.high %v156_v1, %v155_v30, %v484_v31  ;;  %v487_v33 = vmul.u32.u64.low %v156_v1, %v151_v29  ;;  %v488_v34 = vmul.u32.u64.high %v156_v1, %v151_v29, %v487_v33 }
  0x60   :  { %vm102_vm9 = vcmp.eq.f32.partialorder %v99_v63, inf  ;;  %vm104_vm10 = vcmp.eq.f32.partialorder %v99_v63, 0.0  ;;  %v105_v16 = vand.u32 2147483648, %v99_v63 }
  0x61   :  { %vm165_vm5 = vc.u32 %v485_v32, %v487_v33  ;;  %v166_v37 = vadd.s32 1, %v488_v34  ;;  %v164_v52 = vadd.s32 %v487_v33, %v485_v32  ;;  %v26_v33 = vld [vmem:[#allocation4] sm:$0xff] }
  0x63   :  { %v167_v38 = vsel %vm165_vm5, %v166_v37, %v488_v34  ;;  %v27_v34 = vld [vmem:[#allocation4 + $0x8] sm:$0xff] }
  0x64   :  { %v168_v39 = vadd.s32 %v167_v38, %v163_v35 }
  0x66   :  { %v169_v41 = vadd.s32 536870912, %v168_v39 }
  0x68   :  { %v170_v42 = vshrl.u32 %v169_v41, 30  ;;  %v379_v11 = vpop.eup %378 }
  0x69   :  { %v101_v14 = vmul.f32 %v379_v11, %v99_v63 }
  0x6a   :  { %v171_v45 = vshll.u32 %v170_v42, 30  ;;  %v194_v3 = vsub.s32 4, %v170_v42 }
  0x6b   :  { %v103_v17 = vsel %vm102_vm9, %v99_v63, %v101_v14 }
  0x6c   :  { %v172_v47 = vsub.s32 %v168_v39, %v171_v45  ;;  %v195_v6 = vsel %vm110_vm7, %v194_v3, %v170_v42  ;;  %v106_v22 = vsel %vm104_vm10, %v105_v16, %v103_v17 }
  0x6d   :  { %v197_v9 = vsel %vm109_vm8, 0, %v195_v6 }
  0x6e   :  { %v174_v48 = vsub.s32 0, %v172_v47  ;;  %v305_v10 = vadd.s32 3, %v197_v9  ;;  %v201_v12 = vand.u32 3, %v197_v9 }
  0x70   :  { %v355_v49 = vmin.u32 %v174_v48, %v172_v47  ;;  %v306_v13 = vand.u32 3, %v305_v10  ;;  %vm206_vm11 = vcmp.eq.s32.totalorder %v201_v12, 2  ;;  %vm203_vm13 = vcmp.eq.s32.totalorder %v201_v12, 0 }
  0x71   :  { %vm202_vm15 = vcmp.lt.s32.totalorder %v201_v12, 2 }
  0x72   :  { %v176_v50 = vclz %v355_v49  ;;  %vm311_vm12 = vcmp.eq.s32.totalorder %v306_v13, 2  ;;  %vm308_vm14 = vcmp.eq.s32.totalorder %v306_v13, 0  ;;  %vm307_vm0 = vcmp.lt.s32.totalorder %v306_v13, 2 }
  0x74   :  { %v356_v51 = vadd.s32 4294967294, %v176_v50 }
  0x76   :  { %vm357_vm6 = vcmp.lt.s32.totalorder %v356_v51, 0 }
  0x77   :  { %v179_v54 = vsel %vm357_vm6, 0, %v356_v51 }
  0x78   :  { %v180_v55 = vsub.s32 32, %v179_v54  ;;  %v181_v56 = vshll.u32 %v172_v47, %v179_v54  ;;  %v184_v57 = vsub.s32 4294967266, %v179_v54 }
  0x7a   :  { %v182_v59 = vshrl.u32 %v164_v52, %v180_v55  ;;  %v185_v60 = vadd.s32 127, %v184_v57 }
  0x7c   :  { %v183_v61 = vor.u32 %v182_v59, %v181_v56  ;;  %v186_v62 = vshll.u32 %v185_v60, 23 }
  0x7e   :  { %v187_v0 = vor.u32 4788187, %v186_v62  ;;  %v190_v1 = vcvt.s32.f32 %v183_v61 }
  0x80   :  { %v188_v2 = vand.u32 2147483647, %v187_v0 }
  0x82   :  { %v191_v4 = vmul.f32 %v190_v1, %v188_v2 }
  0x84   :  { %v192_v5 = vxor.u32 2147483648, %v191_v4 }
  0x86   :  { %v193_v7 = vsel %vm110_vm7, %v192_v5, %v191_v4 }
  0x87   :  { %v196_v8 = vsel %vm109_vm8, %v478_v43, %v193_v7 }
  0x88   :  { %380 = vcosq.f32 %v196_v8 }
  0x89   :  { %382 = vsinq.f32 %v196_v8 }
  0x92   :  { %v381_v15 = vpop.eup %380 }
  0x93   :  { %v383_v46 = vpop.eup %382  ;;  %v207_v18 = vxor.u32 2147483648, %v381_v15 }
  0x94   :  { %v204_v19 = vxor.u32 2147483648, %v383_v46 }
  0x95   :  { %v208_v20 = vsel %vm206_vm11, %v207_v18, %v383_v46  ;;  %v313_v21 = vsel %vm311_vm12, %v207_v18, %v383_v46 }
  0x96   :  { %v205_v23 = vsel %vm203_vm13, %v381_v15, %v204_v19  ;;  %v310_v24 = vsel %vm308_vm14, %v381_v15, %v204_v19 }
  0x97   :  { %v209_v25 = vsel %vm202_vm15, %v205_v23, %v208_v20  ;;  %v314_v26 = vsel %vm307_vm0, %v310_v24, %v313_v21 }
  0x98   :  { %v210_v27 = vsel %vm200_vm1, nan, %v209_v25  ;;  %v315_v28 = vsel %vm200_vm1, nan, %v314_v26 }
  0x99   :  { %v211_v29 = vmul.f32 %v210_v27, %v106_v22  ;;  %v316_v30 = vmul.f32 %v315_v28, %v106_v22 }
  0x9b   :  { %v317_v31 = vmul.f32 0.1, %v211_v29  ;;  %v318_v32 = vmul.f32 0.1, %v316_v30 }
  0x9d   :  { %v319_v35 = vadd.f32 1.0, %v317_v31  ;;  %v320_v36 = vadd.f32 1.0, %v318_v32 }
  0x9f   :  { %v321_v43 = vmul.f32 %v319_v35, %v26_v33  ;;  %v322_v37 = vmul.f32 %v320_v36, %v27_v34 }
  0xa1   :  { %323 = vst [vmem:[#allocation7] sm:$0xff] %v321_v43  ;;  %324 = vst [vmem:[#allocation7 + $0x8] sm:$0xff] %v322_v37 }
  0xa2   :  { %417 = shalt.err (!%p414_p12)
}
  0xa3   :  { %s418_s4 = scalar_lea.hbm %s516_s2, 256 }
  0xa4   :  { %p419_p13 = scmp.ne.s32.totalorder %s516_s2, %s418_s4  ;;  %p422_p0 = scmp.lt.u32.totalorder %s418_s4, %s516_s2 }
  0xa6   :  { %p424_p1 = pnand %p422_p0, %p419_p13 }
  0xa8   :  { %427 = shalt.err (!%p424_p1)
}
  0xa9   :  { %336 = dma.vmem_to_hbm [thread:$0]  %s331_s1, 256, %s516_s2, [#allocation6], %s433_s19, %s433_s19, %s434_s20  }
  0xaa   :  { %430 = dma.done.wait [#allocation6], 256  }
  0xab   :  { %431 = vsyncadd [#allocation6], 4294967040 }
  0xac   :  { %340 = vsyncpa [#allocation5], 1 }
  0xad   :  { %341 = vsyncpa [#allocation6], 1 }

</bundles_post_ra>
